<compile_context>
chip_gen: v6e
topology: v6e:2x2x1
jax: 0.10.0
libtpu: 0.0.40
codegen_flags: <defaults>
</compile_context>

<pallas_src>
import math

import jax
import jax.numpy as jnp
from jax.experimental import pallas as pl
from jax.experimental.pallas import tpu as pltpu


def _round_up(n, m):
    return ((n + m - 1) // m) * m


# ----------------------------- Pallas kernel -------------------------------

def _mlp_fused_kernel(x_ref, w1_ref, b1_ref, w2_ref, b2_ref, wc_ref, bc_ref,
                      h1_ref, h2_ref, y_ref):
    x = x_ref[...]                                                   # [tn, C_in]

    # layer 1: Linear + ReLU (MyMLPLayer.act; BaseGNN's extra F.relu is idempotent)
    h1 = jnp.dot(x, w1_ref[...], preferred_element_type=jnp.float32) + b1_ref[...]
    h1 = jnp.maximum(h1, 0.0)

    # layer 2: Linear + ReLU
    h2 = jnp.dot(h1, w2_ref[...], preferred_element_type=jnp.float32) + b2_ref[...]
    h2 = jnp.maximum(h2, 0.0)

    # classifier: plain Linear (no activation)
    y = jnp.dot(h2, wc_ref[...], preferred_element_type=jnp.float32) + bc_ref[...]

    # Each result is stored exactly once into its own output ref (block last
    # dim == full array width, so the (8,128) rule is satisfied).
    h1_ref[...] = h1.astype(h1_ref.dtype)
    h2_ref[...] = h2.astype(h2_ref.dtype)
    y_ref[...] = y.astype(y_ref.dtype)


# ------------------------------ tile selection ------------------------------

def _choose_tile(N, tile_n):
    """Pick a node-tile size: multiple of 8, <= tile_n, prefers (a) >=2 grid
    steps (v7x megacore) and (b) dividing round_up(N, 8) exactly so no
    wrapper-side jnp.pad copy of x is needed."""
    n8 = _round_up(N, 8)
    tile = max(8, min(_round_up(tile_n, 8), n8))

    # v7x has 2 TensorCores: keep at least 2 parallel grid steps when possible.
    if n8 // tile < 2 and n8 >= 16:
        tile = max(8, _round_up(n8 // 2, 8))

    # Prefer a tile that divides n8 exactly (avoids padding x), as long as it
    # does not shrink the tile too much (keeps per-step overhead amortised).
    if n8 % tile != 0:
        best = None
        for d in range(tile, 7, -8):
            if n8 % d == 0:
                best = d
                break
        if best is not None and (best * 2 >= tile or best >= 512):
            tile = best

    n_pad = _round_up(max(N, tile), tile)
    return tile, n_pad


# ------------------------------- wrapper ------------------------------------

def mlp_forward(x, params, *, tile_n=2048):
    """Fused MLP forward. x: [N, C_in] float32.  Returns (h_list, [y_pred], [None])."""
    (w1, b1), (w2, b2), (wc, bc) = params
    N, c_in = x.shape
    c_hid = w1.shape[1]
    c_out = wc.shape[1]

    tile, n_pad = _choose_tile(N, tile_n)
    if n_pad != N:
        x = jnp.pad(x, ((0, n_pad - N), (0, 0)))

    grid = (n_pad // tile,)

    def row_tile(c):
        return pl.BlockSpec((tile, c), lambda i: (i, 0))

    def whole(shape):
        return pl.BlockSpec(shape, lambda i: (0, 0))

    flops = 2 * n_pad * (c_in * c_hid + c_hid * c_hid + c_hid * c_out)
    bytes_accessed = 4 * (
        n_pad * c_in                                # x read
        + n_pad * (2 * c_hid + c_out)               # h1 + h2 + y written (no padding)
        + c_in * c_hid + c_hid                      # layer 1 params
        + c_hid * c_hid + c_hid                     # layer 2 params
        + c_hid * c_out + c_out                     # classifier params
    )

    h1, h2, y = pl.pallas_call(
        _mlp_fused_kernel,
        out_shape=(
            jax.ShapeDtypeStruct((n_pad, c_hid), jnp.float32),
            jax.ShapeDtypeStruct((n_pad, c_hid), jnp.float32),
            jax.ShapeDtypeStruct((n_pad, c_out), jnp.float32),
        ),
        grid_spec=pltpu.PrefetchScalarGridSpec(
            num_scalar_prefetch=0,
            grid=grid,
            in_specs=[
                row_tile(c_in),          # x tile
                whole(w1.shape), whole(b1.shape),
                whole(w2.shape), whole(b2.shape),
                whole(wc.shape), whole(bc.shape),
            ],
            out_specs=[
                row_tile(c_hid),         # h1 tile
                row_tile(c_hid),         # h2 tile
                row_tile(c_out),         # y tile
            ],
        ),
        compiler_params=pltpu.CompilerParams(
            dimension_semantics=("parallel",)),
        cost_estimate=pl.CostEstimate(
            flops=flops, transcendentals=0, bytes_accessed=bytes_accessed),
    )(x, w1, b1, w2, b2, wc, bc)

    if n_pad != N:
        h1, h2, y = h1[:N], h2[:N], y[:N]
    return [h1, h2], [y], [None]


# ------------------------ deterministic parameter init ---------------------

def _init_linear(key, fan_in, fan_out):
    """nn.Linear default init: U(-1/sqrt(fan_in), 1/sqrt(fan_in)) for weight & bias."""
    kw, kb = jax.random.split(key)
    bound = 1.0 / math.sqrt(fan_in)
    w = jax.random.uniform(kw, (fan_in, fan_out), jnp.float32, -bound, bound)
    b = jax.random.uniform(kb, (1, fan_out), jnp.float32, -bound, bound)
    return w, b


def make_params(key, c_in, c_hid, c_out):
    k1, k2, k3 = jax.random.split(key, 3)
    return (
        _init_linear(k1, c_in, c_hid),    # layer 1
        _init_linear(k2, c_hid, c_hid),   # layer 2
        _init_linear(k3, c_hid, c_out),   # classifier
    )


# ----------------------------------- main -----------------------------------

if __name__ == "__main__":
    key = jax.random.PRNGKey(0)
    k_x, k_p = jax.random.split(key)

    N, C_IN, C_HID, C_OUT = 128, 16, 32, 8   # 128 "nodes", small feature dims
    x = jax.random.normal(k_x, (N, C_IN), jnp.float32)
    params = make_params(k_p, C_IN, C_HID, C_OUT)

    h_list, y_list, e_w_list = mlp_forward(x, params)
    jax.block_until_ready((h_list, y_list))

    # pure-JAX reference for sanity (same eval-mode semantics)
    (w1, b1), (w2, b2), (wc, bc) = params
    r1 = jnp.maximum(x @ w1 + b1, 0.0)
    r2 = jnp.maximum(r1 @ w2 + b2, 0.0)
    ry = r2 @ wc + bc
    assert jnp.allclose(h_list[0], r1, atol=1e-5, rtol=1e-5)
    assert jnp.allclose(h_list[1], r2, atol=1e-5, rtol=1e-5)
    assert jnp.allclose(y_list[0], ry, atol=1e-5, rtol=1e-5)
    assert e_w_list == [None]

    print("KERNEL_OK")
</pallas_src>

<mosaic_0001>
module attributes {stable_mosaic.version = 11 : i64} {
  func.func @_mlp_fused_kernel(%arg0: i32, %arg1: memref<64x16xf32, #tpu.memory_space<vmem>>, %arg2: memref<16x32xf32, #tpu.memory_space<vmem>>, %arg3: memref<1x32xf32, #tpu.memory_space<vmem>>, %arg4: memref<32x32xf32, #tpu.memory_space<vmem>>, %arg5: memref<1x32xf32, #tpu.memory_space<vmem>>, %arg6: memref<32x8xf32, #tpu.memory_space<vmem>>, %arg7: memref<1x8xf32, #tpu.memory_space<vmem>>, %arg8: memref<64x32xf32, #tpu.memory_space<vmem>>, %arg9: memref<64x32xf32, #tpu.memory_space<vmem>>, %arg10: memref<64x8xf32, #tpu.memory_space<vmem>>) attributes {dimension_semantics = [#tpu.dimension_semantics<parallel>], iteration_bounds = array<i64: 2>, scalar_prefetch = 0 : i64, scratch_operands = 0 : i64, tpu.core_type = #tpu.core_type<tc>, window_params = [{transform_indices = @transform_0, window_bounds = array<i64: 64, 16>}, {pipeline_mode = #tpu.pipeline_mode<synchronous>, transform_indices = @transform_1, window_bounds = array<i64: 16, 32>}, {pipeline_mode = #tpu.pipeline_mode<synchronous>, transform_indices = @transform_2, window_bounds = array<i64: 1, 32>}, {pipeline_mode = #tpu.pipeline_mode<synchronous>, transform_indices = @transform_3, window_bounds = array<i64: 32, 32>}, {pipeline_mode = #tpu.pipeline_mode<synchronous>, transform_indices = @transform_4, window_bounds = array<i64: 1, 32>}, {pipeline_mode = #tpu.pipeline_mode<synchronous>, transform_indices = @transform_5, window_bounds = array<i64: 32, 8>}, {pipeline_mode = #tpu.pipeline_mode<synchronous>, transform_indices = @transform_6, window_bounds = array<i64: 1, 8>}, {transform_indices = @transform_7, window_bounds = array<i64: 64, 32>}, {transform_indices = @transform_8, window_bounds = array<i64: 64, 32>}, {transform_indices = @transform_9, window_bounds = array<i64: 64, 8>}]} {
    %c0 = arith.constant 0 : index
    %c0_0 = arith.constant 0 : index
    %0 = vector.load %arg1[%c0, %c0_0] : memref<64x16xf32, #tpu.memory_space<vmem>>, vector<64x16xf32>
    %c0_1 = arith.constant 0 : index
    %c0_2 = arith.constant 0 : index
    %1 = vector.load %arg2[%c0_1, %c0_2] : memref<16x32xf32, #tpu.memory_space<vmem>>, vector<16x32xf32>
    %cst = arith.constant dense<0.000000e+00> : vector<64x32xf32>
    %2 = tpu.matmul %0, %1, %cst {dimension_numbers = #tpu.dot_dimension_numbers<[1], [0], [0], [1], [0, 0, 1, 1], [], []>} : vector<64x16xf32>, vector<16x32xf32>, vector<64x32xf32> -> vector<64x32xf32>
    %c0_3 = arith.constant 0 : index
    %c0_4 = arith.constant 0 : index
    %3 = vector.load %arg3[%c0_3, %c0_4] : memref<1x32xf32, #tpu.memory_space<vmem>>, vector<1x32xf32>
    %4 = vector.broadcast %3 : vector<1x32xf32> to vector<64x32xf32>
    %5 = arith.addf %2, %4 : vector<64x32xf32>
    %cst_5 = arith.constant 0.000000e+00 : f32
    %6 = vector.broadcast %cst_5 : f32 to vector<64x32xf32>
    %7 = arith.maximumf %5, %6 : vector<64x32xf32>
    %c0_6 = arith.constant 0 : index
    %c0_7 = arith.constant 0 : index
    %8 = vector.load %arg4[%c0_6, %c0_7] : memref<32x32xf32, #tpu.memory_space<vmem>>, vector<32x32xf32>
    %cst_8 = arith.constant dense<0.000000e+00> : vector<64x32xf32>
    %9 = tpu.matmul %7, %8, %cst_8 {dimension_numbers = #tpu.dot_dimension_numbers<[1], [0], [0], [1], [0, 0, 1, 1], [], []>} : vector<64x32xf32>, vector<32x32xf32>, vector<64x32xf32> -> vector<64x32xf32>
    %c0_9 = arith.constant 0 : index
    %c0_10 = arith.constant 0 : index
    %10 = vector.load %arg5[%c0_9, %c0_10] : memref<1x32xf32, #tpu.memory_space<vmem>>, vector<1x32xf32>
    %11 = vector.broadcast %10 : vector<1x32xf32> to vector<64x32xf32>
    %12 = arith.addf %9, %11 : vector<64x32xf32>
    %cst_11 = arith.constant 0.000000e+00 : f32
    %13 = vector.broadcast %cst_11 : f32 to vector<64x32xf32>
    %14 = arith.maximumf %12, %13 : vector<64x32xf32>
    %c0_12 = arith.constant 0 : index
    %c0_13 = arith.constant 0 : index
    %15 = vector.load %arg6[%c0_12, %c0_13] : memref<32x8xf32, #tpu.memory_space<vmem>>, vector<32x8xf32>
    %cst_14 = arith.constant dense<0.000000e+00> : vector<64x8xf32>
    %16 = tpu.matmul %14, %15, %cst_14 {dimension_numbers = #tpu.dot_dimension_numbers<[1], [0], [0], [1], [0, 0, 1, 1], [], []>} : vector<64x32xf32>, vector<32x8xf32>, vector<64x8xf32> -> vector<64x8xf32>
    %c0_15 = arith.constant 0 : index
    %c0_16 = arith.constant 0 : index
    %17 = vector.load %arg7[%c0_15, %c0_16] : memref<1x8xf32, #tpu.memory_space<vmem>>, vector<1x8xf32>
    %18 = vector.broadcast %17 : vector<1x8xf32> to vector<64x8xf32>
    %19 = arith.addf %16, %18 : vector<64x8xf32>
    %c0_17 = arith.constant 0 : index
    %c0_18 = arith.constant 0 : index
    %20 = vector.load %arg8[%c0_17, %c0_18] : memref<64x32xf32, #tpu.memory_space<vmem>>, vector<64x32xf32>
    tpu.vector_store %arg8[%c0_17, %c0_18], %7 {strides = array<i32>} : memref<64x32xf32, #tpu.memory_space<vmem>>, vector<64x32xf32>,
    %c0_19 = arith.constant 0 : index
    %c0_20 = arith.constant 0 : index
    %21 = vector.load %arg9[%c0_19, %c0_20] : memref<64x32xf32, #tpu.memory_space<vmem>>, vector<64x32xf32>
    tpu.vector_store %arg9[%c0_19, %c0_20], %14 {strides = array<i32>} : memref<64x32xf32, #tpu.memory_space<vmem>>, vector<64x32xf32>,
    %c0_21 = arith.constant 0 : index
    %c0_22 = arith.constant 0 : index
    %22 = vector.load %arg10[%c0_21, %c0_22] : memref<64x8xf32, #tpu.memory_space<vmem>>, vector<64x8xf32>
    tpu.vector_store %arg10[%c0_21, %c0_22], %19 {strides = array<i32>} : memref<64x8xf32, #tpu.memory_space<vmem>>, vector<64x8xf32>,
    return
  }
  func.func @transform_0(%arg0: i32) -> (i32, i32) {
    %c0_i32 = arith.constant 0 : i32
    %c0_i32_0 = arith.constant 0 : i32
    return %arg0, %c0_i32 : i32, i32
  }
  func.func @transform_1(%arg0: i32) -> (i32, i32) {
    %c0_i32 = arith.constant 0 : i32
    %c0_i32_0 = arith.constant 0 : i32
    %c0_i32_1 = arith.constant 0 : i32
    return %c0_i32, %c0_i32_0 : i32, i32
  }
  func.func @transform_2(%arg0: i32) -> (i32, i32) {
    %c0_i32 = arith.constant 0 : i32
    %c0_i32_0 = arith.constant 0 : i32
    %c0_i32_1 = arith.constant 0 : i32
    return %c0_i32, %c0_i32_0 : i32, i32
  }
  func.func @transform_3(%arg0: i32) -> (i32, i32) {
    %c0_i32 = arith.constant 0 : i32
    %c0_i32_0 = arith.constant 0 : i32
    %c0_i32_1 = arith.constant 0 : i32
    return %c0_i32, %c0_i32_0 : i32, i32
  }
  func.func @transform_4(%arg0: i32) -> (i32, i32) {
    %c0_i32 = arith.constant 0 : i32
    %c0_i32_0 = arith.constant 0 : i32
    %c0_i32_1 = arith.constant 0 : i32
    return %c0_i32, %c0_i32_0 : i32, i32
  }
  func.func @transform_5(%arg0: i32) -> (i32, i32) {
    %c0_i32 = arith.constant 0 : i32
    %c0_i32_0 = arith.constant 0 : i32
    %c0_i32_1 = arith.constant 0 : i32
    return %c0_i32, %c0_i32_0 : i32, i32
  }
  func.func @transform_6(%arg0: i32) -> (i32, i32) {
    %c0_i32 = arith.constant 0 : i32
    %c0_i32_0 = arith.constant 0 : i32
    %c0_i32_1 = arith.constant 0 : i32
    return %c0_i32, %c0_i32_0 : i32, i32
  }
  func.func @transform_7(%arg0: i32) -> (i32, i32) {
    %c0_i32 = arith.constant 0 : i32
    %c0_i32_0 = arith.constant 0 : i32
    return %arg0, %c0_i32 : i32, i32
  }
  func.func @transform_8(%arg0: i32) -> (i32, i32) {
    %c0_i32 = arith.constant 0 : i32
    %c0_i32_0 = arith.constant 0 : i32
    return %arg0, %c0_i32 : i32, i32
  }
  func.func @transform_9(%arg0: i32) -> (i32, i32) {
    %c0_i32 = arith.constant 0 : i32
    %c0_i32_0 = arith.constant 0 : i32
    return %arg0, %c0_i32 : i32, i32
  }
}

</mosaic_0001>

<bundles_post_ra>
// kernel: tpu_custom_call.1
= control target key start
LH: loop header
LB: loop body
LE: loop exit
PB: predicated region body
PF: predicated region fallthrough
CT: control target
= control target key end

     0   :  { %s1158_s30 = smov 0   ;;  %s1294_s0 = inlined_call_operand.vmem [shape: f32[128,16], index: 0, kind: input, shape index: {}]   ;;  %s1295_s1 = inlined_call_operand.vmem [shape: f32[16,32], index: 1, kind: input, shape index: {}]   ;;  %s1296_s2 = inlined_call_operand.vmem [shape: f32[1,32], index: 2, kind: input, shape index: {}]   ;;  %s1297_s3 = inlined_call_operand.vmem [shape: f32[32,32], index: 3, kind: input, shape index: {}]   ;;  %s1298_s4 = inlined_call_operand.vmem [shape: f32[1,32], index: 4, kind: input, shape index: {}]   ;;  %s1299_s5 = inlined_call_operand.vmem [shape: f32[32,8], index: 5, kind: input, shape index: {}]   ;;  %s1300_s6 = inlined_call_operand.vmem [shape: f32[1,8], index: 6, kind: input, shape index: {}]   ;;  %s1301_s7 = inlined_call_operand.vmem [shape: f32[128,32], index: 7, kind: output, shape index: {0}]   ;;  %s1302_s8 = inlined_call_operand.vmem [shape: f32[128,32], index: 8, kind: output, shape index: {1}]   ;;  %s1303_s9 = inlined_call_operand.vmem [shape: f32[128,8], index: 9, kind: output, shape index: {2}]  }
   0x1 LB: > { %s956_s10 = sadd.s32 4294967295, %s1106_s30   ;;  %p960_p0 = scmp.ge.s32.totalorder %s1106_s30, 1  ;;  %s1106_s30 = sphi %s1158_s30, %s20_s30  }
   0x2   : > { %p293_p1 = scmp.lt.s32.totalorder %s1106_s30, 3 }
   0x4   : > { %p294_p2 = pnand %p960_p0, %p293_p1 }
   0x5   : > { %s961_s15 = sshll.u32 (!%p294_p2), %s956_s10, 3 }
   0x6   : > { %297 = sbr.rel (%p294_p2) target bundleno = 627 (0x273), region = 48  ;;  %p340_p3 = scmp.lt.s32.totalorder (!%p294_p2), %s961_s15, 15 }
   0xb   : > { %v372_v0 = vld [vmem:[%s1295_s1 + $0x8] sm:$0xff]  ;;  %v371_v1 = vld [vmem:[%s1295_s1] sm:$0xff]  ;;  %v521_v2 = vld [vmem:[%s1297_s3 + $0x18] sm:$0xff]  ;;  %s1305_s15 = smov (!%p340_p3, %s961_s15), 15  ;;  %vm380_vm0 = vcmask 130048   ;;  %vm529_vm1 = vcmask 261120  }
   0xc   : > { %1032 = vmatprep.subr.mxu0 %v372_v0  ;;  %1088 = vmatprep.subr.mxu1 %v372_v0  ;;  %s1175_s18 = sshll.u32 %s1305_s15, 3  ;;  %v520_v11 = vld [vmem:[%s1297_s3 + $0x10] sm:$0xff]  ;;  %v519_v12 = vld [vmem:[%s1297_s3 + $0x8] sm:$0xff]  ;;  %v518_v13 = vld [vmem:[%s1297_s3] sm:$0xff]  ;;  %vm823_vm2 = vcmask 64512  }
   0xd   : > { %1033 = vmatpush3.msra.mxu0 %v372_v0  ;;  %1090 = vmatpush3.msra.mxu1 %v372_v0  ;;  %s343_s21 = scalar_lea.vmem %s1294_s0, %s1175_s18  ;;  %v670_v14 = vld [vmem:[%s1299_s5 + $0x18] sm:$0xff]  ;;  %v969_v15 = vld [vmem:[%s1296_s2] ss:$0 sm:$0xff]  ;;  %s1208_s14 = scalar_lea.vmem %s1301_s7, %s1175_s18  ;;  %v669_v40 = vld [vmem:[%s1299_s5 + $0x10] sm:$0xff] }
   0xe   : > { %1034 = vmatprep.subr.mxu0 %v371_v1  ;;  %1089 = vmatprep.subr.mxu1 %v371_v1  ;;  %v363_v3 = vld [vmem:[%s343_s21] sm:$0xff]  ;;  %v364_v4 = vld [vmem:[%s343_s21 + $0x8] sm:$0xff]  ;;  %v365_v5 = vld [vmem:[%s343_s21 + $0x10] sm:$0xff]  ;;  %s1250_s26 = scalar_lea.vmem %s1302_s8, %s1175_s18  ;;  %s361_s11 = scalar_lea.vmem %s1303_s9, %s1175_s18 }
   0xf   : > { %1035 = vmatpush3.msra.mxu0 %v371_v1  ;;  %1091 = vmatpush3.msra.mxu1 %v371_v1  ;;  %v367_v6 = vld [vmem:[%s343_s21 + $0x20] sm:$0xff]  ;;  %v368_v7 = vld [vmem:[%s343_s21 + $0x28] sm:$0xff]  ;;  %v369_v8 = vld [vmem:[%s343_s21 + $0x30] sm:$0xff] }
  0x10   : > { %1048 = vmatprep.subr.mxu1 %v521_v2  ;;  %1036 = vmatprep.mubr.msk.f32.mxu0 %vm380_vm0, %v363_v3  ;;  %v366_v9 = vld [vmem:[%s343_s21 + $0x18] sm:$0xff]  ;;  %v668_v41 = vld [vmem:[%s1299_s5 + $0x8] sm:$0xff]  ;;  %v667_v42 = vld [vmem:[%s1299_s5] sm:$0xff] }
  0x11   : > { %1037 = vmatmul.mubr.msk.f32.vlgmr.msra.gmra.mxu0 %vm380_vm0, %v364_v4  ;;  %1042 = vmatprep.mubr.msk.f32.mxu1 %vm380_vm0, %v367_v6  ;;  %v370_v10 = vld [vmem:[%s343_s21 + $0x38] sm:$0xff]  ;;  %v978_v43 = vld [vmem:[%s1298_s4] ss:$0 sm:$0xff] }
  0x12   : > { %1039 = vmatprep.mubr.msk.f32.mxu0 %vm380_vm0, %v365_v5  ;;  %1043 = vmatmul.mubr.msk.f32.vlgmr.msra.gmra.mxu1 %vm380_vm0, %v368_v7  ;;  %v987_v4 = vld [vmem:[%s1300_s6] ss:$0 sm:$0xff] }
  0x13   : > { %1045 = vmatprep.mubr.msk.f32.mxu1 %vm380_vm0, %v369_v8  ;;  %1049 = vmatpush3.msra.mxu1 %v521_v2 }
  0x14   : > { %1050 = vmatprep.subr.mxu1 %v520_v11  ;;  %1068 = vmatprep.subr.mxu0 %v670_v14 }
  0x15   : > { %1040 = vmatmul.mubr.msk.f32.gmra.mxu0 %vm380_vm0, %v366_v9  ;;  %1051 = vmatpush3.msra.mxu1 %v520_v11 }
  0x16   : > { %1046 = vmatmul.mubr.msk.f32.gmra.mxu1 %vm380_vm0, %v370_v10  ;;  %1052 = vmatprep.subr.mxu1 %v519_v12 }
  0x17   : > { %1053 = vmatpush3.msra.mxu1 %v519_v12  ;;  %1069 = vmatpush3.msra.mxu0 %v670_v14 }
  0x18   : > { %1054 = vmatprep.subr.mxu1 %v518_v13  ;;  %1070 = vmatprep.subr.mxu0 %v669_v40 }
  0x19   : > { %1055 = vmatpush3.msra.mxu1 %v518_v13  ;;  %1071 = vmatpush3.msra.mxu0 %v669_v40 }
  0x1a   : > { %1072 = vmatprep.subr.mxu0 %v668_v41 }
  0x1b   : > { %1073 = vmatpush3.msra.mxu0 %v668_v41 }
  0x1c   : > { %1074 = vmatprep.subr.mxu0 %v667_v42 }
  0x1d   : > { %1075 = vmatpush3.msra.mxu0 %v667_v42 }
  0xd1   : > { %v1038_v16 = vpop.f32.mrf.mxu0 }
  0xd2   : > { %v477_v17 = vadd.f32 %v1038_v16, %v969_v15  ;;  %v1044_v18 = vpop.f32.mrf.mxu1 }
  0xd3   : > { %v471_v19 = vpop.f32.mrf.mxu0  ;;  %v497_v20 = vadd.f32 %v1044_v18, %v969_v15 }
  0xd4   : > { %v511_v21 = vmax.f32 %v477_v17, 0.0  ;;  %v472_v22 = vadd.f32 %v969_v15, %v471_v19  ;;  %v491_v23 = vpop.f32.mrf.mxu1 }
  0xd5   : > { %v1041_v24 = vpop.f32.mrf.mxu0  ;;  %v515_v25 = vmax.f32 %v497_v20, 0.0  ;;  %v492_v26 = vadd.f32 %v969_v15, %v491_v23 }
  0xd6   : > { %808 = vst.msk [vmem:[%s1208_s14 + $0x8] sm:$0xff] %vm529_vm1, %v511_v21  ;;  %v510_v27 = vmax.f32 %v472_v22, 0.0  ;;  %v487_v28 = vadd.f32 %v1041_v24, %v969_v15  ;;  %v1047_v29 = vpop.f32.mrf.mxu1 }
  0xd7   : > { %v481_v30 = vpop.f32.mrf.mxu0  ;;  %812 = vst.msk [vmem:[%s1208_s14 + $0x28] sm:$0xff] %vm529_vm1, %v515_v25  ;;  %v514_v31 = vmax.f32 %v492_v26, 0.0  ;;  %v507_v32 = vadd.f32 %v1047_v29, %v969_v15 }
  0xd8   : > { %807 = vst.msk [vmem:[%s1208_s14] sm:$0xff] %vm529_vm1, %v510_v27  ;;  %v513_v33 = vmax.f32 %v487_v28, 0.0  ;;  %v482_v34 = vadd.f32 %v969_v15, %v481_v30  ;;  %1056 = vmatprep.mubr.msk.f32.mxu1 %vm529_vm1, %v510_v27  ;;  %v501_v35 = vpop.f32.mrf.mxu1 }
  0xd9   : > { %811 = vst.msk [vmem:[%s1208_s14 + $0x20] sm:$0xff] %vm529_vm1, %v514_v31  ;;  %1057 = vmatmul.mubr.msk.f32.vlgmr.msra.gmra.mxu1 %vm529_vm1, %v511_v21  ;;  %v517_v36 = vmax.f32 %v507_v32, 0.0  ;;  %v502_v37 = vadd.f32 %v969_v15, %v501_v35 }
  0xda   : > { %810 = vst.msk [vmem:[%s1208_s14 + $0x18] sm:$0xff] %vm529_vm1, %v513_v33  ;;  %v512_v38 = vmax.f32 %v482_v34, 0.0 }
  0xdb   : > { %814 = vst.msk [vmem:[%s1208_s14 + $0x38] sm:$0xff] %vm529_vm1, %v517_v36  ;;  %v516_v39 = vmax.f32 %v502_v37, 0.0 }
  0xdc   : > { %809 = vst.msk [vmem:[%s1208_s14 + $0x10] sm:$0xff] %vm529_vm1, %v512_v38  ;;  %1059 = vmatprep.mubr.msk.f32.mxu1 %vm529_vm1, %v512_v38 }
  0xdd   : > { %813 = vst.msk [vmem:[%s1208_s14 + $0x30] sm:$0xff] %vm529_vm1, %v516_v39  ;;  %1060 = vmatmul.mubr.msk.f32.gmra.mxu1 %vm529_vm1, %v513_v33 }
  0xde   : > { %1062 = vmatprep.mubr.msk.f32.mxu1 %vm529_vm1, %v514_v31 }
  0xe1   : > { %1063 = vmatmul.mubr.msk.f32.gmra.mxu1 %vm529_vm1, %v515_v25 }
  0xe2   : > { %1065 = vmatprep.mubr.msk.f32.mxu1 %vm529_vm1, %v516_v39 }
  0xe5   : > { %1066 = vmatmul.mubr.msk.f32.gmra.mxu1 %vm529_vm1, %v517_v36 }
 0x199   : > { %v1058_v44 = vpop.f32.mrf.mxu1 }
 0x19a   : > { %v626_v45 = vadd.f32 %v1058_v44, %v978_v43 }
 0x19b   : > { %v620_v46 = vpop.f32.mrf.mxu1 }
 0x19c   : > { %v660_v47 = vmax.f32 %v626_v45, 0.0  ;;  %v621_v48 = vadd.f32 %v978_v43, %v620_v46 }
 0x19d   : > { %v1061_v49 = vpop.f32.mrf.mxu1 }
 0x19e   : > { %816 = vst.msk [vmem:[%s1250_s26 + $0x8] sm:$0xff] %vm529_vm1, %v660_v47  ;;  %v659_v50 = vmax.f32 %v621_v48, 0.0  ;;  %v636_v51 = vadd.f32 %v1061_v49, %v978_v43 }
 0x19f   : > { %v630_v52 = vpop.f32.mrf.mxu1 }
 0x1a0   : > { %815 = vst.msk [vmem:[%s1250_s26] sm:$0xff] %vm529_vm1, %v659_v50  ;;  %v662_v53 = vmax.f32 %v636_v51, 0.0  ;;  %v631_v54 = vadd.f32 %v978_v43, %v630_v52  ;;  %1076 = vmatprep.mubr.msk.f32.mxu0 %vm529_vm1, %v659_v50 }
 0x1a1   : > { %v1064_v55 = vpop.f32.mrf.mxu1  ;;  %1077 = vmatmul.mubr.msk.f32.vlgmr.msra.gmra.mxu0 %vm529_vm1, %v660_v47 }
 0x1a2   : > { %818 = vst.msk [vmem:[%s1250_s26 + $0x18] sm:$0xff] %vm529_vm1, %v662_v53  ;;  %v661_v56 = vmax.f32 %v631_v54, 0.0  ;;  %v646_v57 = vadd.f32 %v1064_v55, %v978_v43 }
 0x1a3   : > { %v640_v58 = vpop.f32.mrf.mxu1 }
 0x1a4   : > { %817 = vst.msk [vmem:[%s1250_s26 + $0x10] sm:$0xff] %vm529_vm1, %v661_v56  ;;  %v664_v59 = vmax.f32 %v646_v57, 0.0  ;;  %v641_v60 = vadd.f32 %v978_v43, %v640_v58  ;;  %1079 = vmatprep.mubr.msk.f32.mxu0 %vm529_vm1, %v661_v56 }
 0x1a5   : > { %v1067_v61 = vpop.f32.mrf.mxu1  ;;  %1080 = vmatmul.mubr.msk.f32.gmra.mxu0 %vm529_vm1, %v662_v53 }
 0x1a6   : > { %820 = vst.msk [vmem:[%s1250_s26 + $0x28] sm:$0xff] %vm529_vm1, %v664_v59  ;;  %v663_v62 = vmax.f32 %v641_v60, 0.0  ;;  %v656_v63 = vadd.f32 %v1067_v61, %v978_v43 }
 0x1a7   : > { %v650_v0 = vpop.f32.mrf.mxu1 }
 0x1a8   : > { %819 = vst.msk [vmem:[%s1250_s26 + $0x20] sm:$0xff] %vm529_vm1, %v663_v62  ;;  %v666_v1 = vmax.f32 %v656_v63, 0.0  ;;  %v651_v2 = vadd.f32 %v978_v43, %v650_v0  ;;  %1082 = vmatprep.mubr.msk.f32.mxu0 %vm529_vm1, %v663_v62 }
 0x1a9   : > { %1083 = vmatmul.mubr.msk.f32.gmra.mxu0 %vm529_vm1, %v664_v59 }
 0x1aa   : > { %822 = vst.msk [vmem:[%s1250_s26 + $0x38] sm:$0xff] %vm529_vm1, %v666_v1  ;;  %v665_v3 = vmax.f32 %v651_v2, 0.0 }
 0x1ac   : > { %821 = vst.msk [vmem:[%s1250_s26 + $0x30] sm:$0xff] %vm529_vm1, %v665_v3  ;;  %1085 = vmatprep.mubr.msk.f32.mxu0 %vm529_vm1, %v665_v3 }
 0x1ad   : > { %1086 = vmatmul.mubr.msk.f32.gmra.mxu0 %vm529_vm1, %v666_v1 }
 0x261   : > { %v1078_v5 = vpop.f32.mrf.mxu0 }
 0x262   : > { %v774_v6 = vadd.f32 %v1078_v5, %v987_v4 }
 0x263   : > { %v768_v7 = vpop.f32.mrf.mxu0 }
 0x264   : > { %825 = vst.msk [vmem:[%s361_s11 + $0x8] sm:$0xff] %vm823_vm2, %v774_v6  ;;  %v769_v8 = vadd.f32 %v987_v4, %v768_v7 }
 0x265   : > { %v1081_v9 = vpop.f32.mrf.mxu0 }
 0x266   : > { %824 = vst.msk [vmem:[%s361_s11] sm:$0xff] %vm823_vm2, %v769_v8  ;;  %v784_v10 = vadd.f32 %v1081_v9, %v987_v4 }
 0x267   : > { %v778_v11 = vpop.f32.mrf.mxu0 }
 0x268   : > { %827 = vst.msk [vmem:[%s361_s11 + $0x18] sm:$0xff] %vm823_vm2, %v784_v10  ;;  %v779_v12 = vadd.f32 %v987_v4, %v778_v11 }
 0x269   : > { %v1084_v13 = vpop.f32.mrf.mxu0 }
 0x26a   : > { %826 = vst.msk [vmem:[%s361_s11 + $0x10] sm:$0xff] %vm823_vm2, %v779_v12  ;;  %v794_v14 = vadd.f32 %v1084_v13, %v987_v4 }
 0x26b   : > { %v788_v15 = vpop.f32.mrf.mxu0 }
 0x26c   : > { %829 = vst.msk [vmem:[%s361_s11 + $0x28] sm:$0xff] %vm823_vm2, %v794_v14  ;;  %v789_v16 = vadd.f32 %v987_v4, %v788_v15 }
 0x26d   : > { %v1087_v17 = vpop.f32.mrf.mxu0 }
 0x26e   : > { %828 = vst.msk [vmem:[%s361_s11 + $0x20] sm:$0xff] %vm823_vm2, %v789_v16  ;;  %v804_v18 = vadd.f32 %v1087_v17, %v987_v4 }
 0x26f   : > { %v798_v19 = vpop.f32.mrf.mxu0 }
 0x270   : > { %831 = vst.msk [vmem:[%s361_s11 + $0x38] sm:$0xff] %vm823_vm2, %v804_v18  ;;  %v799_v20 = vadd.f32 %v987_v4, %v798_v19 }
 0x272   : > { %830 = vst.msk [vmem:[%s361_s11 + $0x30] sm:$0xff] %vm823_vm2, %v799_v20 }
 0x273 PF: > { %s20_s30 = sadd.s32 1, %s1106_s30  }
 0x274   : > { %p17_p4 = scmp.ge.s32.totalorder %s20_s30, 4  }
 0x276   :  { %19 = sbr.rel (!%p17_p4) target bundleno = 1 (0x1), region = 102 }

</bundles_post_ra>
